<compile_context>
chip_gen: v7x
topology: tpu7x:2x2x1
jax: 0.10.0
libtpu: 0.0.40
codegen_flags: <defaults>
</compile_context>

<pallas_src>
import math

import jax
import jax.numpy as jnp
import numpy as np
from jax import lax
from jax.experimental import pallas as pl
from jax.experimental.pallas import tpu as pltpu


# ----------------------------------------------------------------------------
# Pallas kernels
# ----------------------------------------------------------------------------
def fused_gru2_kernel(
    x_ref,              # (T*B, C)  layer-0 input, seq-major flattened
    h00_ref, h01_ref,   # (B, H)    initial hidden state for layer 0 / layer 1
    wi0_ref, wh0_ref, bi0_ref, bh0_ref,   # layer 0: (C,3H) (H,3H) (1,3H) (1,3H)
    wi1_ref, wh1_ref, bi1_ref, bh1_ref,   # layer 1: (H,3H) (H,3H) (1,3H) (1,3H)
    y_ref,              # (T*B, H)  layer-1 outputs (seq-major flattened)
    hout_ref,           # (2, B, H) final hidden states
    gi_scr,             # VMEM (T*B, 3H) f32 — precomputed input projections
    y0_scr,             # VMEM (T*B, H)  f32 — layer-0 outputs (stay in VMEM)
):
    TB, H = y_ref.shape
    B = h00_ref.shape[0]
    T = TB // B

    def gru_pass(wi_ref, wh_ref, bi_ref, bh_ref, xin, h_init, out_ref):
        # Hoisted input projection: one big MXU matmul covers all T steps.
        gi_scr[...] = (
            jnp.dot(xin, wi_ref[...], preferred_element_type=jnp.float32)
            + bi_ref[...]
        )
        wh = wh_ref[...]
        bh = bh_ref[...]

        def step(t, h):
            row = pl.multiple_of(t * B, B)
            gi = gi_scr[pl.ds(row, B), :]                         # (B, 3H)
            gh = jnp.dot(h, wh, preferred_element_type=jnp.float32) + bh
            r = jax.nn.sigmoid(gi[:, 0:H] + gh[:, 0:H])
            z = jax.nn.sigmoid(gi[:, H:2 * H] + gh[:, H:2 * H])
            n = jnp.tanh(gi[:, 2 * H:3 * H] + r * gh[:, 2 * H:3 * H])
            h_new = (1.0 - z) * n + z * h
            out_ref[pl.ds(row, B), :] = h_new.astype(out_ref.dtype)
            return h_new

        return lax.fori_loop(0, T, step, h_init)

    h0_fin = gru_pass(wi0_ref, wh0_ref, bi0_ref, bh0_ref,
                      x_ref[...], h00_ref[...].astype(jnp.float32), y0_scr)
    h1_fin = gru_pass(wi1_ref, wh1_ref, bi1_ref, bh1_ref,
                      y0_scr[...], h01_ref[...].astype(jnp.float32), y_ref)

    hout_ref[0] = h0_fin.astype(hout_ref.dtype)
    hout_ref[1] = h1_fin.astype(hout_ref.dtype)


def linear_kernel(x_ref, w_ref, b_ref, o_ref):
    o_ref[...] = (
        jnp.dot(x_ref[...], w_ref[...], preferred_element_type=jnp.float32)
        + b_ref[...]
    ).astype(o_ref.dtype)


# ----------------------------------------------------------------------------
# Wrappers (glue: BlockSpecs / grids / reshapes / weight concat)
# ----------------------------------------------------------------------------
def _full_spec(shape):
    return pl.BlockSpec(shape, lambda i, _s=shape: (0,) * len(_s))


def _concat_layer(p):
    wi = jnp.concatenate([p["wir"], p["wiz"], p["win"]], axis=1)   # (in, 3H)
    wh = jnp.concatenate([p["whr"], p["whz"], p["whn"]], axis=1)   # (H, 3H)
    bi = jnp.concatenate([p["bir"], p["biz"], p["bin"]], axis=1)   # (1, 3H)
    bh = jnp.concatenate([p["bhr"], p["bhz"], p["bhn"]], axis=1)   # (1, 3H)
    return wi, wh, bi, bh


def fused_gru2(x, hidden, params):
    """x: (T, B, C), hidden: (2, B, H) -> y_flat: (T*B, H), h_out: (2, B, H)."""
    T, B, C = x.shape
    H = hidden.shape[-1]

    wi0, wh0, bi0, bh0 = _concat_layer(params["layer0"])
    wi1, wh1, bi1, bh1 = _concat_layer(params["layer1"])
    x2d = jnp.reshape(x, (T * B, C))          # seq-major flatten (cheap, in HBM)

    y_flat, h_out = pl.pallas_call(
        fused_gru2_kernel,
        out_shape=(
            jax.ShapeDtypeStruct((T * B, H), jnp.float32),
            jax.ShapeDtypeStruct((2, B, H), jnp.float32),
        ),
        grid_spec=pltpu.PrefetchScalarGridSpec(
            num_scalar_prefetch=0,
            grid=(1,),
            in_specs=[
                _full_spec((T * B, C)),
                _full_spec((B, H)), _full_spec((B, H)),
                _full_spec((C, 3 * H)), _full_spec((H, 3 * H)),
                _full_spec((1, 3 * H)), _full_spec((1, 3 * H)),
                _full_spec((H, 3 * H)), _full_spec((H, 3 * H)),
                _full_spec((1, 3 * H)), _full_spec((1, 3 * H)),
            ],
            out_specs=[
                _full_spec((T * B, H)),
                _full_spec((2, B, H)),
            ],
            scratch_shapes=[
                pltpu.VMEM((T * B, 3 * H), jnp.float32),
                pltpu.VMEM((T * B, H), jnp.float32),
            ],
        ),
        compiler_params=pltpu.CompilerParams(dimension_semantics=("arbitrary",)),
    )(x2d, hidden[0], hidden[1], wi0, wh0, bi0, bh0, wi1, wh1, bi1, bh1)
    return y_flat, h_out


def linear(x, w, b):
    B, F = x.shape
    O = w.shape[-1]
    return pl.pallas_call(
        linear_kernel,
        out_shape=jax.ShapeDtypeStruct((B, O), jnp.float32),
        grid_spec=pltpu.PrefetchScalarGridSpec(
            num_scalar_prefetch=0,
            grid=(1,),
            in_specs=[
                _full_spec((B, F)),
                _full_spec((F, O)),
                _full_spec((1, O)),
            ],
            out_specs=_full_spec((B, O)),
        ),
    )(x, w, b)


def gru_forward(x, params, hidden=None):
    """Mirrors GRU.forward: x.view(160,-1,C) -> 2-layer GRU -> flatten -> Linear."""
    C = params["num_channel"]
    H = 2 * C
    T = 160
    x = jnp.reshape(x, (T, -1, C))            # == x.view(160, -1, C)
    B = x.shape[1]
    if hidden is None:
        hidden = jnp.zeros((2, B, H), jnp.float32)

    # TODO(synk): nn.GRU inter-layer dropout is train-only; inference path is identity.
    y_flat, h_out = fused_gru2(x, hidden, params)          # (T*B, H), (2, B, H)

    flat = jnp.reshape(y_flat, (-1, H * T))                # == x.view(-1, 2C*160)
    out = linear(flat, params["lin_w"], params["lin_b"])   # (B, 512)
    return out, h_out


# ----------------------------------------------------------------------------
# Pure-JAX reference (for correctness check)
# ----------------------------------------------------------------------------
def gru_layer_ref(x, h0, p):
    def step(h, x_t):
        gi_r = x_t @ p["wir"] + p["bir"][0]
        gi_z = x_t @ p["wiz"] + p["biz"][0]
        gi_n = x_t @ p["win"] + p["bin"][0]
        gh_r = h @ p["whr"] + p["bhr"][0]
        gh_z = h @ p["whz"] + p["bhz"][0]
        gh_n = h @ p["whn"] + p["bhn"][0]
        r = jax.nn.sigmoid(gi_r + gh_r)
        z = jax.nn.sigmoid(gi_z + gh_z)
        n = jnp.tanh(gi_n + r * gh_n)
        h_new = (1.0 - z) * n + z * h
        return h_new, h_new

    _, ys = lax.scan(step, h0, x)
    return ys


def gru_forward_ref(x, params, hidden=None):
    C = params["num_channel"]
    H = 2 * C
    x = jnp.reshape(x, (160, -1, C))
    T, B, _ = x.shape
    if hidden is None:
        hidden = jnp.zeros((2, B, H), jnp.float32)
    y0 = gru_layer_ref(x, hidden[0], params["layer0"])
    y1 = gru_layer_ref(y0, hidden[1], params["layer1"])
    h_out = jnp.stack([y0[-1], y1[-1]], axis=0)
    flat = jnp.reshape(y1, (-1, H * 160))
    out = flat @ params["lin_w"] + params["lin_b"][0]
    return out, h_out


# ----------------------------------------------------------------------------
# Deterministic parameter init (shapes follow nn.GRU(C, 2C, num_layers=2) + Linear)
# ----------------------------------------------------------------------------
def init_params(key, num_channel):
    C = num_channel
    H = 2 * C
    keys = iter(jax.random.split(key, 32))
    scale = 1.0 / math.sqrt(H)

    def mk(shape, s):
        return jax.random.normal(next(keys), shape, jnp.float32) * s

    def layer_params(in_size):
        return {
            "wir": mk((in_size, H), scale), "wiz": mk((in_size, H), scale),
            "win": mk((in_size, H), scale),
            "whr": mk((H, H), scale), "whz": mk((H, H), scale), "whn": mk((H, H), scale),
            "bir": mk((1, H), scale), "biz": mk((1, H), scale), "bin": mk((1, H), scale),
            "bhr": mk((1, H), scale), "bhz": mk((1, H), scale), "bhn": mk((1, H), scale),
        }

    return {
        "num_channel": C,
        "layer0": layer_params(C),       # weight_ih_l0 is (3H, C)  -> split & transposed
        "layer1": layer_params(H),       # weight_ih_l1 is (3H, 2C) -> split & transposed
        "lin_w": mk((H * 160, 512), 0.05),
        "lin_b": mk((1, 512), 0.05),
    }


# ----------------------------------------------------------------------------
if __name__ == "__main__":
    C = 8          # num_channel
    B = 2          # batch
    T = 160        # sequence length fixed by the module (view(160, -1, C))
    H = 2 * C

    key = jax.random.PRNGKey(0)
    kx, kp = jax.random.split(key)
    x = jax.random.normal(kx, (T, B, C), jnp.float32)
    params = init_params(kp, C)

    out, hidden = gru_forward(x, params)
    out = jax.block_until_ready(out)
    hidden = jax.block_until_ready(hidden)

    assert out.shape == (B, 512)
    assert hidden.shape == (2, B, H)

    out_ref, hidden_ref = gru_forward_ref(x, params)
    np.testing.assert_allclose(np.asarray(out), np.asarray(out_ref), rtol=2e-3, atol=2e-2)
    np.testing.assert_allclose(np.asarray(hidden), np.asarray(hidden_ref), rtol=2e-3, atol=2e-3)

    print("KERNEL_OK")
</pallas_src>

<mosaic_0001>
module attributes {stable_mosaic.version = 11 : i64} {
  func.func @fused_gru2_kernel(%arg0: i32, %arg1: memref<320x8xf32, #tpu.memory_space<vmem>>, %arg2: memref<2x16xf32, #tpu.memory_space<vmem>>, %arg3: memref<2x16xf32, #tpu.memory_space<vmem>>, %arg4: memref<8x48xf32, #tpu.memory_space<vmem>>, %arg5: memref<16x48xf32, #tpu.memory_space<vmem>>, %arg6: memref<1x48xf32, #tpu.memory_space<vmem>>, %arg7: memref<1x48xf32, #tpu.memory_space<vmem>>, %arg8: memref<16x48xf32, #tpu.memory_space<vmem>>, %arg9: memref<16x48xf32, #tpu.memory_space<vmem>>, %arg10: memref<1x48xf32, #tpu.memory_space<vmem>>, %arg11: memref<1x48xf32, #tpu.memory_space<vmem>>, %arg12: memref<320x16xf32, #tpu.memory_space<vmem>>, %arg13: memref<2x2x16xf32, #tpu.memory_space<vmem>>, %arg14: memref<320x48xf32, #tpu.memory_space<vmem>>, %arg15: memref<320x16xf32, #tpu.memory_space<vmem>>) attributes {dimension_semantics = [#tpu.dimension_semantics<arbitrary>], iteration_bounds = array<i64: 1>, scalar_prefetch = 0 : i64, scratch_operands = 2 : i64, tpu.core_type = #tpu.core_type<tc>, window_params = [{pipeline_mode = #tpu.pipeline_mode<synchronous>, transform_indices = @transform_0, window_bounds = array<i64: 320, 8>}, {pipeline_mode = #tpu.pipeline_mode<synchronous>, transform_indices = @transform_1, window_bounds = array<i64: 2, 16>}, {pipeline_mode = #tpu.pipeline_mode<synchronous>, transform_indices = @transform_2, window_bounds = array<i64: 2, 16>}, {pipeline_mode = #tpu.pipeline_mode<synchronous>, transform_indices = @transform_3, window_bounds = array<i64: 8, 48>}, {pipeline_mode = #tpu.pipeline_mode<synchronous>, transform_indices = @transform_4, window_bounds = array<i64: 16, 48>}, {pipeline_mode = #tpu.pipeline_mode<synchronous>, transform_indices = @transform_5, window_bounds = array<i64: 1, 48>}, {pipeline_mode = #tpu.pipeline_mode<synchronous>, transform_indices = @transform_6, window_bounds = array<i64: 1, 48>}, {pipeline_mode = #tpu.pipeline_mode<synchronous>, transform_indices = @transform_7, window_bounds = array<i64: 16, 48>}, {pipeline_mode = #tpu.pipeline_mode<synchronous>, transform_indices = @transform_8, window_bounds = array<i64: 16, 48>}, {pipeline_mode = #tpu.pipeline_mode<synchronous>, transform_indices = @transform_9, window_bounds = array<i64: 1, 48>}, {pipeline_mode = #tpu.pipeline_mode<synchronous>, transform_indices = @transform_10, window_bounds = array<i64: 1, 48>}, {pipeline_mode = #tpu.pipeline_mode<synchronous>, transform_indices = @transform_11, window_bounds = array<i64: 320, 16>}, {pipeline_mode = #tpu.pipeline_mode<synchronous>, transform_indices = @transform_12, window_bounds = array<i64: 2, 2, 16>}]} {
    %c0 = arith.constant 0 : index
    %c0_0 = arith.constant 0 : index
    %0 = vector.load %arg1[%c0, %c0_0] : memref<320x8xf32, #tpu.memory_space<vmem>>, vector<320x8xf32>
    %c0_1 = arith.constant 0 : index
    %c0_2 = arith.constant 0 : index
    %1 = vector.load %arg2[%c0_1, %c0_2] : memref<2x16xf32, #tpu.memory_space<vmem>>, vector<2x16xf32>
    %c0_3 = arith.constant 0 : index
    %c0_4 = arith.constant 0 : index
    %2 = vector.load %arg4[%c0_3, %c0_4] : memref<8x48xf32, #tpu.memory_space<vmem>>, vector<8x48xf32>
    %cst = arith.constant dense<0.000000e+00> : vector<320x48xf32>
    %3 = tpu.matmul %0, %2, %cst {dimension_numbers = #tpu.dot_dimension_numbers<[1], [0], [0], [1], [0, 0, 1, 1], [], []>} : vector<320x8xf32>, vector<8x48xf32>, vector<320x48xf32> -> vector<320x48xf32>
    %c0_5 = arith.constant 0 : index
    %c0_6 = arith.constant 0 : index
    %4 = vector.load %arg6[%c0_5, %c0_6] : memref<1x48xf32, #tpu.memory_space<vmem>>, vector<1x48xf32>
    %5 = vector.broadcast %4 : vector<1x48xf32> to vector<320x48xf32>
    %6 = arith.addf %3, %5 : vector<320x48xf32>
    %c0_7 = arith.constant 0 : index
    %c0_8 = arith.constant 0 : index
    %7 = vector.load %arg14[%c0_7, %c0_8] : memref<320x48xf32, #tpu.memory_space<vmem>>, vector<320x48xf32>
    tpu.vector_store %arg14[%c0_7, %c0_8], %6 {strides = array<i32>} : memref<320x48xf32, #tpu.memory_space<vmem>>, vector<320x48xf32>,
    %c0_9 = arith.constant 0 : index
    %c0_10 = arith.constant 0 : index
    %8 = vector.load %arg5[%c0_9, %c0_10] : memref<16x48xf32, #tpu.memory_space<vmem>>, vector<16x48xf32>
    %c0_11 = arith.constant 0 : index
    %c0_12 = arith.constant 0 : index
    %9 = vector.load %arg7[%c0_11, %c0_12] : memref<1x48xf32, #tpu.memory_space<vmem>>, vector<1x48xf32>
    %c0_i32 = arith.constant 0 : i32
    %c160_i32 = arith.constant 160 : i32
    %10 = arith.addi %c0_i32, %c160_i32 : i32
    %c1_i32 = arith.constant 1 : i32
    %11 = scf.for %arg16 = %c0_i32 to %10 step %c1_i32 iter_args(%arg17 = %1) -> (vector<2x16xf32>)  : i32 {
      %c2_i32 = arith.constant 2 : i32
      %30 = arith.muli %arg16, %c2_i32 : i32
      %31 = tpu.assume_multiple %30, 2 : i32
      %32 = arith.index_cast %31 : i32 to index
      %c0_38 = arith.constant 0 : index
      %33 = vector.load %arg14[%32, %c0_38] : memref<320x48xf32, #tpu.memory_space<vmem>>, vector<2x48xf32>
      %cst_39 = arith.constant dense<0.000000e+00> : vector<2x48xf32>
      %34 = tpu.matmul %arg17, %8, %cst_39 {dimension_numbers = #tpu.dot_dimension_numbers<[1], [0], [0], [1], [0, 0, 1, 1], [], []>} : vector<2x16xf32>, vector<16x48xf32>, vector<2x48xf32> -> vector<2x48xf32>
      %35 = vector.broadcast %9 : vector<1x48xf32> to vector<2x48xf32>
      %36 = arith.addf %34, %35 : vector<2x48xf32>
      %37 = vector.extract_strided_slice %33 {offsets = [0, 0], sizes = [2, 16], strides = [1, 1]} : vector<2x48xf32> to vector<2x16xf32>
      %38 = vector.extract_strided_slice %36 {offsets = [0, 0], sizes = [2, 16], strides = [1, 1]} : vector<2x48xf32> to vector<2x16xf32>
      %39 = arith.addf %37, %38 : vector<2x16xf32>
      %40 = arith.negf %39 : vector<2x16xf32>
      %41 = math.exp %40 : vector<2x16xf32>
      %cst_40 = arith.constant 1.000000e+00 : f32
      %42 = vector.broadcast %cst_40 : f32 to vector<2x16xf32>
      %43 = arith.addf %42, %41 : vector<2x16xf32>
      %44 = arith.divf %42, %43 : vector<2x16xf32>
      %45 = vector.extract_strided_slice %33 {offsets = [0, 16], sizes = [2, 16], strides = [1, 1]} : vector<2x48xf32> to vector<2x16xf32>
      %46 = vector.extract_strided_slice %36 {offsets = [0, 16], sizes = [2, 16], strides = [1, 1]} : vector<2x48xf32> to vector<2x16xf32>
      %47 = arith.addf %45, %46 : vector<2x16xf32>
      %48 = arith.negf %47 : vector<2x16xf32>
      %49 = math.exp %48 : vector<2x16xf32>
      %cst_41 = arith.constant 1.000000e+00 : f32
      %50 = vector.broadcast %cst_41 : f32 to vector<2x16xf32>
      %51 = arith.addf %50, %49 : vector<2x16xf32>
      %52 = arith.divf %50, %51 : vector<2x16xf32>
      %53 = vector.extract_strided_slice %33 {offsets = [0, 32], sizes = [2, 16], strides = [1, 1]} : vector<2x48xf32> to vector<2x16xf32>
      %54 = vector.extract_strided_slice %36 {offsets = [0, 32], sizes = [2, 16], strides = [1, 1]} : vector<2x48xf32> to vector<2x16xf32>
      %55 = arith.mulf %44, %54 : vector<2x16xf32>
      %56 = arith.addf %53, %55 : vector<2x16xf32>
      %57 = math.tanh %56 : vector<2x16xf32>
      %cst_42 = arith.constant 1.000000e+00 : f32
      %58 = vector.broadcast %cst_42 : f32 to vector<2x16xf32>
      %59 = arith.subf %58, %52 : vector<2x16xf32>
      %60 = arith.mulf %59, %57 : vector<2x16xf32>
      %61 = arith.mulf %52, %arg17 : vector<2x16xf32>
      %62 = arith.addf %60, %61 : vector<2x16xf32>
      %63 = arith.index_cast %31 : i32 to index
      %c0_43 = arith.constant 0 : index
      %64 = vector.load %arg15[%63, %c0_43] : memref<320x16xf32, #tpu.memory_space<vmem>>, vector<2x16xf32>
      tpu.vector_store %arg15[%63, %c0_43], %62 {strides = array<i32>} : memref<320x16xf32, #tpu.memory_space<vmem>>, vector<2x16xf32>,
      scf.yield %62 : vector<2x16xf32>
    }
    %c160_i32_13 = arith.constant 160 : i32
    %c0_14 = arith.constant 0 : index
    %c0_15 = arith.constant 0 : index
    %12 = vector.load %arg15[%c0_14, %c0_15] : memref<320x16xf32, #tpu.memory_space<vmem>>, vector<320x16xf32>
    %c0_16 = arith.constant 0 : index
    %c0_17 = arith.constant 0 : index
    %13 = vector.load %arg3[%c0_16, %c0_17] : memref<2x16xf32, #tpu.memory_space<vmem>>, vector<2x16xf32>
    %c0_18 = arith.constant 0 : index
    %c0_19 = arith.constant 0 : index
    %14 = vector.load %arg8[%c0_18, %c0_19] : memref<16x48xf32, #tpu.memory_space<vmem>>, vector<16x48xf32>
    %cst_20 = arith.constant dense<0.000000e+00> : vector<320x48xf32>
    %15 = tpu.matmul %12, %14, %cst_20 {dimension_numbers = #tpu.dot_dimension_numbers<[1], [0], [0], [1], [0, 0, 1, 1], [], []>} : vector<320x16xf32>, vector<16x48xf32>, vector<320x48xf32> -> vector<320x48xf32>
    %c0_21 = arith.constant 0 : index
    %c0_22 = arith.constant 0 : index
    %16 = vector.load %arg10[%c0_21, %c0_22] : memref<1x48xf32, #tpu.memory_space<vmem>>, vector<1x48xf32>
    %17 = vector.broadcast %16 : vector<1x48xf32> to vector<320x48xf32>
    %18 = arith.addf %15, %17 : vector<320x48xf32>
    %c0_23 = arith.constant 0 : index
    %c0_24 = arith.constant 0 : index
    %19 = vector.load %arg14[%c0_23, %c0_24] : memref<320x48xf32, #tpu.memory_space<vmem>>, vector<320x48xf32>
    tpu.vector_store %arg14[%c0_23, %c0_24], %18 {strides = array<i32>} : memref<320x48xf32, #tpu.memory_space<vmem>>, vector<320x48xf32>,
    %c0_25 = arith.constant 0 : index
    %c0_26 = arith.constant 0 : index
    %20 = vector.load %arg9[%c0_25, %c0_26] : memref<16x48xf32, #tpu.memory_space<vmem>>, vector<16x48xf32>
    %c0_27 = arith.constant 0 : index
    %c0_28 = arith.constant 0 : index
    %21 = vector.load %arg11[%c0_27, %c0_28] : memref<1x48xf32, #tpu.memory_space<vmem>>, vector<1x48xf32>
    %c0_i32_29 = arith.constant 0 : i32
    %c160_i32_30 = arith.constant 160 : i32
    %22 = arith.addi %c0_i32_29, %c160_i32_30 : i32
    %c1_i32_31 = arith.constant 1 : i32
    %23 = scf.for %arg16 = %c0_i32_29 to %22 step %c1_i32_31 iter_args(%arg17 = %13) -> (vector<2x16xf32>)  : i32 {
      %c2_i32 = arith.constant 2 : i32
      %30 = arith.muli %arg16, %c2_i32 : i32
      %31 = tpu.assume_multiple %30, 2 : i32
      %32 = arith.index_cast %31 : i32 to index
      %c0_38 = arith.constant 0 : index
      %33 = vector.load %arg14[%32, %c0_38] : memref<320x48xf32, #tpu.memory_space<vmem>>, vector<2x48xf32>
      %cst_39 = arith.constant dense<0.000000e+00> : vector<2x48xf32>
      %34 = tpu.matmul %arg17, %20, %cst_39 {dimension_numbers = #tpu.dot_dimension_numbers<[1], [0], [0], [1], [0, 0, 1, 1], [], []>} : vector<2x16xf32>, vector<16x48xf32>, vector<2x48xf32> -> vector<2x48xf32>
      %35 = vector.broadcast %21 : vector<1x48xf32> to vector<2x48xf32>
      %36 = arith.addf %34, %35 : vector<2x48xf32>
      %37 = vector.extract_strided_slice %33 {offsets = [0, 0], sizes = [2, 16], strides = [1, 1]} : vector<2x48xf32> to vector<2x16xf32>
      %38 = vector.extract_strided_slice %36 {offsets = [0, 0], sizes = [2, 16], strides = [1, 1]} : vector<2x48xf32> to vector<2x16xf32>
      %39 = arith.addf %37, %38 : vector<2x16xf32>
      %40 = arith.negf %39 : vector<2x16xf32>
      %41 = math.exp %40 : vector<2x16xf32>
      %cst_40 = arith.constant 1.000000e+00 : f32
      %42 = vector.broadcast %cst_40 : f32 to vector<2x16xf32>
      %43 = arith.addf %42, %41 : vector<2x16xf32>
      %44 = arith.divf %42, %43 : vector<2x16xf32>
      %45 = vector.extract_strided_slice %33 {offsets = [0, 16], sizes = [2, 16], strides = [1, 1]} : vector<2x48xf32> to vector<2x16xf32>
      %46 = vector.extract_strided_slice %36 {offsets = [0, 16], sizes = [2, 16], strides = [1, 1]} : vector<2x48xf32> to vector<2x16xf32>
      %47 = arith.addf %45, %46 : vector<2x16xf32>
      %48 = arith.negf %47 : vector<2x16xf32>
      %49 = math.exp %48 : vector<2x16xf32>
      %cst_41 = arith.constant 1.000000e+00 : f32
      %50 = vector.broadcast %cst_41 : f32 to vector<2x16xf32>
      %51 = arith.addf %50, %49 : vector<2x16xf32>
      %52 = arith.divf %50, %51 : vector<2x16xf32>
      %53 = vector.extract_strided_slice %33 {offsets = [0, 32], sizes = [2, 16], strides = [1, 1]} : vector<2x48xf32> to vector<2x16xf32>
      %54 = vector.extract_strided_slice %36 {offsets = [0, 32], sizes = [2, 16], strides = [1, 1]} : vector<2x48xf32> to vector<2x16xf32>
      %55 = arith.mulf %44, %54 : vector<2x16xf32>
      %56 = arith.addf %53, %55 : vector<2x16xf32>
      %57 = math.tanh %56 : vector<2x16xf32>
      %cst_42 = arith.constant 1.000000e+00 : f32
      %58 = vector.broadcast %cst_42 : f32 to vector<2x16xf32>
      %59 = arith.subf %58, %52 : vector<2x16xf32>
      %60 = arith.mulf %59, %57 : vector<2x16xf32>
      %61 = arith.mulf %52, %arg17 : vector<2x16xf32>
      %62 = arith.addf %60, %61 : vector<2x16xf32>
      %63 = arith.index_cast %31 : i32 to index
      %c0_43 = arith.constant 0 : index
      %64 = vector.load %arg12[%63, %c0_43] : memref<320x16xf32, #tpu.memory_space<vmem>>, vector<2x16xf32>
      tpu.vector_store %arg12[%63, %c0_43], %62 {strides = array<i32>} : memref<320x16xf32, #tpu.memory_space<vmem>>, vector<2x16xf32>,
      scf.yield %62 : vector<2x16xf32>
    }
    %c160_i32_32 = arith.constant 160 : i32
    %c0_33 = arith.constant 0 : index
    %c0_34 = arith.constant 0 : index
    %c0_35 = arith.constant 0 : index
    %24 = vector.load %arg13[%c0_33, %c0_34, %c0_35] : memref<2x2x16xf32, #tpu.memory_space<vmem>>, vector<1x2x16xf32>
    %25 = vector.shape_cast %24 : vector<1x2x16xf32> to vector<2x16xf32>
    %26 = vector.shape_cast %11 : vector<2x16xf32> to vector<1x2x16xf32>
    tpu.vector_store %arg13[%c0_33, %c0_34, %c0_35], %26 {strides = array<i32>} : memref<2x2x16xf32, #tpu.memory_space<vmem>>, vector<1x2x16xf32>,
    %c1 = arith.constant 1 : index
    %c0_36 = arith.constant 0 : index
    %c0_37 = arith.constant 0 : index
    %27 = vector.load %arg13[%c1, %c0_36, %c0_37] : memref<2x2x16xf32, #tpu.memory_space<vmem>>, vector<1x2x16xf32>
    %28 = vector.shape_cast %27 : vector<1x2x16xf32> to vector<2x16xf32>
    %29 = vector.shape_cast %23 : vector<2x16xf32> to vector<1x2x16xf32>
    tpu.vector_store %arg13[%c1, %c0_36, %c0_37], %29 {strides = array<i32>} : memref<2x2x16xf32, #tpu.memory_space<vmem>>, vector<1x2x16xf32>,
    return
  }
  func.func @transform_0(%arg0: i32) -> (i32, i32) {
    %c0_i32 = arith.constant 0 : i32
    %c0_i32_0 = arith.constant 0 : i32
    %c0_i32_1 = arith.constant 0 : i32
    return %c0_i32, %c0_i32_0 : i32, i32
  }
  func.func @transform_1(%arg0: i32) -> (i32, i32) {
    %c0_i32 = arith.constant 0 : i32
    %c0_i32_0 = arith.constant 0 : i32
    %c0_i32_1 = arith.constant 0 : i32
    return %c0_i32, %c0_i32_0 : i32, i32
  }
  func.func @transform_2(%arg0: i32) -> (i32, i32) {
    %c0_i32 = arith.constant 0 : i32
    %c0_i32_0 = arith.constant 0 : i32
    %c0_i32_1 = arith.constant 0 : i32
    return %c0_i32, %c0_i32_0 : i32, i32
  }
  func.func @transform_3(%arg0: i32) -> (i32, i32) {
    %c0_i32 = arith.constant 0 : i32
    %c0_i32_0 = arith.constant 0 : i32
    %c0_i32_1 = arith.constant 0 : i32
    return %c0_i32, %c0_i32_0 : i32, i32
  }
  func.func @transform_4(%arg0: i32) -> (i32, i32) {
    %c0_i32 = arith.constant 0 : i32
    %c0_i32_0 = arith.constant 0 : i32
    %c0_i32_1 = arith.constant 0 : i32
    return %c0_i32, %c0_i32_0 : i32, i32
  }
  func.func @transform_5(%arg0: i32) -> (i32, i32) {
    %c0_i32 = arith.constant 0 : i32
    %c0_i32_0 = arith.constant 0 : i32
    %c0_i32_1 = arith.constant 0 : i32
    return %c0_i32, %c0_i32_0 : i32, i32
  }
  func.func @transform_6(%arg0: i32) -> (i32, i32) {
    %c0_i32 = arith.constant 0 : i32
    %c0_i32_0 = arith.constant 0 : i32
    %c0_i32_1 = arith.constant 0 : i32
    return %c0_i32, %c0_i32_0 : i32, i32
  }
  func.func @transform_7(%arg0: i32) -> (i32, i32) {
    %c0_i32 = arith.constant 0 : i32
    %c0_i32_0 = arith.constant 0 : i32
    %c0_i32_1 = arith.constant 0 : i32
    return %c0_i32, %c0_i32_0 : i32, i32
  }
  func.func @transform_8(%arg0: i32) -> (i32, i32) {
    %c0_i32 = arith.constant 0 : i32
    %c0_i32_0 = arith.constant 0 : i32
    %c0_i32_1 = arith.constant 0 : i32
    return %c0_i32, %c0_i32_0 : i32, i32
  }
  func.func @transform_9(%arg0: i32) -> (i32, i32) {
    %c0_i32 = arith.constant 0 : i32
    %c0_i32_0 = arith.constant 0 : i32
    %c0_i32_1 = arith.constant 0 : i32
    return %c0_i32, %c0_i32_0 : i32, i32
  }
  func.func @transform_10(%arg0: i32) -> (i32, i32) {
    %c0_i32 = arith.constant 0 : i32
    %c0_i32_0 = arith.constant 0 : i32
    %c0_i32_1 = arith.constant 0 : i32
    return %c0_i32, %c0_i32_0 : i32, i32
  }
  func.func @transform_11(%arg0: i32) -> (i32, i32) {
    %c0_i32 = arith.constant 0 : i32
    %c0_i32_0 = arith.constant 0 : i32
    %c0_i32_1 = arith.constant 0 : i32
    return %c0_i32, %c0_i32_0 : i32, i32
  }
  func.func @transform_12(%arg0: i32) -> (i32, i32, i32) {
    %c0_i32 = arith.constant 0 : i32
    %c0_i32_0 = arith.constant 0 : i32
    %c0_i32_1 = arith.constant 0 : i32
    %c0_i32_2 = arith.constant 0 : i32
    return %c0_i32, %c0_i32_0, %c0_i32_1 : i32, i32, i32
  }
}

</mosaic_0001>

<bundles_post_ra>
// kernel: tpu_custom_call.1
= control target key start
LH: loop header
LB: loop body
LE: loop exit
PB: predicated region body
PF: predicated region fallthrough
CT: control target
= control target key end

     0   :  { %18 = vsyncpa [#allocation5], 0  ;;  %vm90_vm0 = vcmask 64512   ;;  %vm476_vm1 = vcmask 392192   ;;  %s2309_s0 = inlined_call_operand.vmem [shape: f32[320,8], index: 0, kind: input, shape index: {}]   ;;  %s2310_s1 = inlined_call_operand.vmem [shape: f32[2,16], index: 1, kind: input, shape index: {}]   ;;  %s2311_s2 = inlined_call_operand.vmem [shape: f32[2,16], index: 2, kind: input, shape index: {}]   ;;  %s2312_s3 = inlined_call_operand.vmem [shape: f32[8,48], index: 3, kind: input, shape index: {}]   ;;  %s2313_s4 = inlined_call_operand.vmem [shape: f32[16,48], index: 4, kind: input, shape index: {}]   ;;  %s2314_s5 = inlined_call_operand.vmem [shape: f32[1,48], index: 5, kind: input, shape index: {}]   ;;  %s2315_s6 = inlined_call_operand.vmem [shape: f32[1,48], index: 6, kind: input, shape index: {}]   ;;  %s2316_s7 = inlined_call_operand.vmem [shape: f32[16,48], index: 7, kind: input, shape index: {}]   ;;  %s2317_s8 = inlined_call_operand.vmem [shape: f32[16,48], index: 8, kind: input, shape index: {}]   ;;  %s2318_s9 = inlined_call_operand.vmem [shape: f32[1,48], index: 9, kind: input, shape index: {}]   ;;  %s2319_s10 = inlined_call_operand.vmem [shape: f32[1,48], index: 10, kind: input, shape index: {}]   ;;  %s2320_s11 = inlined_call_operand.vmem [shape: f32[320,16], index: 11, kind: output, shape index: {0}]   ;;  %s2321_s12 = inlined_call_operand.hbm [shape: f32[2,2,16], index: 12, kind: output, shape index: {1}]  }
   0x1   :  { %v1833_v0 = vld [vmem:[%s2310_s1] sm:$0x3]   ;;  %v42_v4 = vld [vmem:[%s2309_s0 + $0x8] sm:$0xff]  ;;  %v43_v6 = vld [vmem:[%s2309_s0 + $0x10] sm:$0xff] }
   0x2   :  { %v82_v1 = vld [vmem:[%s2312_s3] sm:$0xff]  ;;  %v62_v5 = vld [vmem:[%s2309_s0 + $0xa8] sm:$0xff]  ;;  %v63_v7 = vld [vmem:[%s2309_s0 + $0xb0] sm:$0xff] }
   0x3   :  { %1477 = vmatprep.subr.mxu0 %v82_v1  ;;  %1627 = vmatprep.subr.mxu1 %v82_v1  ;;  %v41_v2 = vld [vmem:[%s2309_s0] sm:$0xff]  ;;  %v44_v8 = vld [vmem:[%s2309_s0 + $0x18] sm:$0xff]  ;;  %v46_v12 = vld [vmem:[%s2309_s0 + $0x28] sm:$0xff] }
   0x4   :  { %v61_v3 = vld [vmem:[%s2309_s0 + $0xa0] sm:$0xff]  ;;  %1478 = vmatpush3.msra.mxu0 %v82_v1  ;;  %1628 = vmatpush3.msra.mxu1 %v82_v1  ;;  %v64_v9 = vld [vmem:[%s2309_s0 + $0xb8] sm:$0xff]  ;;  %v66_v13 = vld [vmem:[%s2309_s0 + $0xc8] sm:$0xff] }
   0x5   :  { %1479 = vmatprep.mubr.msk.f32.mxu0 %vm90_vm0, %v41_v2  ;;  %1509 = vmatprep.mubr.msk.f32.mxu1 %vm90_vm0, %v61_v3  ;;  %v45_v10 = vld [vmem:[%s2309_s0 + $0x20] sm:$0xff]  ;;  %v47_v14 = vld [vmem:[%s2309_s0 + $0x30] sm:$0xff]  ;;  %v48_v16 = vld [vmem:[%s2309_s0 + $0x38] sm:$0xff] }
   0x6   :  { %1480 = vmatmul.mubr.msk.f32.vlgmr.msra.gmra.mrb[0].mxu0 %vm90_vm0, %v42_v4  ;;  %1510 = vmatmul.mubr.msk.f32.vlgmr.msra.gmra.mrb[0].mxu1 %vm90_vm0, %v62_v5  ;;  %v65_v11 = vld [vmem:[%s2309_s0 + $0xc0] sm:$0xff]  ;;  %v67_v15 = vld [vmem:[%s2309_s0 + $0xd0] sm:$0xff]  ;;  %v68_v17 = vld [vmem:[%s2309_s0 + $0xd8] sm:$0xff] }
   0x7   :  { %1482 = vmatprep.mubr.msk.f32.mxu0 %vm90_vm0, %v43_v6  ;;  %1512 = vmatprep.mubr.msk.f32.mxu1 %vm90_vm0, %v63_v7  ;;  %v49_v18 = vld [vmem:[%s2309_s0 + $0x40] sm:$0xff]  ;;  %v50_v20 = vld [vmem:[%s2309_s0 + $0x48] sm:$0xff]  ;;  %v51_v22 = vld [vmem:[%s2309_s0 + $0x50] sm:$0xff] }
   0x8   :  { %v69_v19 = vld [vmem:[%s2309_s0 + $0xe0] sm:$0xff]  ;;  %v70_v21 = vld [vmem:[%s2309_s0 + $0xe8] sm:$0xff]  ;;  %v71_v23 = vld [vmem:[%s2309_s0 + $0xf0] sm:$0xff] }
   0x9   :  { %v52_v24 = vld [vmem:[%s2309_s0 + $0x58] sm:$0xff]  ;;  %v53_v26 = vld [vmem:[%s2309_s0 + $0x60] sm:$0xff]  ;;  %v54_v28 = vld [vmem:[%s2309_s0 + $0x68] sm:$0xff] }
   0xa   :  { %1483 = vmatmul.mubr.msk.f32.gmra.mrb[2].mxu0 %vm90_vm0, %v44_v8  ;;  %1513 = vmatmul.mubr.msk.f32.gmra.mrb[2].mxu1 %vm90_vm0, %v64_v9  ;;  %v72_v25 = vld [vmem:[%s2309_s0 + $0xf8] sm:$0xff]  ;;  %v73_v27 = vld [vmem:[%s2309_s0 + $0x100] sm:$0xff]  ;;  %v74_v29 = vld [vmem:[%s2309_s0 + $0x108] sm:$0xff] }
   0xb   :  { %1485 = vmatprep.mubr.msk.f32.mxu0 %vm90_vm0, %v45_v10  ;;  %1515 = vmatprep.mubr.msk.f32.mxu1 %vm90_vm0, %v65_v11  ;;  %v55_v30 = vld [vmem:[%s2309_s0 + $0x70] sm:$0xff]  ;;  %v56_v32 = vld [vmem:[%s2309_s0 + $0x78] sm:$0xff]  ;;  %v57_v34 = vld [vmem:[%s2309_s0 + $0x80] sm:$0xff] }
   0xc   :  { %v75_v31 = vld [vmem:[%s2309_s0 + $0x110] sm:$0xff]  ;;  %v76_v33 = vld [vmem:[%s2309_s0 + $0x118] sm:$0xff]  ;;  %v77_v35 = vld [vmem:[%s2309_s0 + $0x120] sm:$0xff] }
   0xd   :  { %v58_v36 = vld [vmem:[%s2309_s0 + $0x88] sm:$0xff]  ;;  %v59_v38 = vld [vmem:[%s2309_s0 + $0x90] sm:$0xff]  ;;  %v60_v40 = vld [vmem:[%s2309_s0 + $0x98] sm:$0xff] }
   0xe   :  { %1486 = vmatmul.mubr.msk.f32.gmra.mrb[4].mxu0 %vm90_vm0, %v46_v12  ;;  %1516 = vmatmul.mubr.msk.f32.gmra.mrb[4].mxu1 %vm90_vm0, %v66_v13  ;;  %v78_v37 = vld [vmem:[%s2309_s0 + $0x128] sm:$0xff]  ;;  %v79_v39 = vld [vmem:[%s2309_s0 + $0x130] sm:$0xff]  ;;  %v80_v41 = vld [vmem:[%s2309_s0 + $0x138] sm:$0xff] }
   0xf   :  { %1488 = vmatprep.mubr.msk.f32.mxu0 %vm90_vm0, %v47_v14  ;;  %1518 = vmatprep.mubr.msk.f32.mxu1 %vm90_vm0, %v67_v15  ;;  %v2001_v42 = vld [vmem:[%s2313_s4] sm:$0xff]  ;;  %v2006_v43 = vld [vmem:[%s2313_s4 + $0x8] sm:$0xff]  ;;  %s2099_s4 = smov 0  }
  0x10   :  { %v2011_v44 = vld [vmem:[%s2315_s6] ss:$0 sm:$0xff] }
  0x11   :  { %v2016_v45 = vld [vmem:[%s2314_s5] ss:$0 sm:$0xff] }
  0x12   :  { %1489 = vmatmul.mubr.msk.f32.gmra.mrb[6].mxu0 %vm90_vm0, %v48_v16  ;;  %1519 = vmatmul.mubr.msk.f32.gmra.mrb[6].mxu1 %vm90_vm0, %v68_v17 }
  0x13   :  { %1491 = vmatprep.mubr.msk.f32.mxu0 %vm90_vm0, %v49_v18  ;;  %1521 = vmatprep.mubr.msk.f32.mxu1 %vm90_vm0, %v69_v19 }
  0x16   :  { %1492 = vmatmul.mubr.msk.f32.gmra.mrb[8].mxu0 %vm90_vm0, %v50_v20  ;;  %1522 = vmatmul.mubr.msk.f32.gmra.mrb[8].mxu1 %vm90_vm0, %v70_v21 }
  0x17   :  { %1494 = vmatprep.mubr.msk.f32.mxu0 %vm90_vm0, %v51_v22  ;;  %1524 = vmatprep.mubr.msk.f32.mxu1 %vm90_vm0, %v71_v23 }
  0x1a   :  { %1495 = vmatmul.mubr.msk.f32.gmra.mrb[10].mxu0 %vm90_vm0, %v52_v24  ;;  %1525 = vmatmul.mubr.msk.f32.gmra.mrb[10].mxu1 %vm90_vm0, %v72_v25 }
  0x1b   :  { %1497 = vmatprep.mubr.msk.f32.mxu0 %vm90_vm0, %v53_v26  ;;  %1527 = vmatprep.mubr.msk.f32.mxu1 %vm90_vm0, %v73_v27 }
  0x1e   :  { %1498 = vmatmul.mubr.msk.f32.gmra.mrb[12].mxu0 %vm90_vm0, %v54_v28  ;;  %1528 = vmatmul.mubr.msk.f32.gmra.mrb[12].mxu1 %vm90_vm0, %v74_v29 }
  0x1f   :  { %1500 = vmatprep.mubr.msk.f32.mxu0 %vm90_vm0, %v55_v30  ;;  %1530 = vmatprep.mubr.msk.f32.mxu1 %vm90_vm0, %v75_v31 }
  0x22   :  { %1501 = vmatmul.mubr.msk.f32.gmra.mrb[14].mxu0 %vm90_vm0, %v56_v32  ;;  %1531 = vmatmul.mubr.msk.f32.gmra.mrb[14].mxu1 %vm90_vm0, %v76_v33 }
  0x23   :  { %1503 = vmatprep.mubr.msk.f32.mxu0 %vm90_vm0, %v57_v34  ;;  %1533 = vmatprep.mubr.msk.f32.mxu1 %vm90_vm0, %v77_v35 }
  0x26   :  { %1504 = vmatmul.mubr.msk.f32.gmra.mrb[16].mxu0 %vm90_vm0, %v58_v36  ;;  %1534 = vmatmul.mubr.msk.f32.gmra.mrb[16].mxu1 %vm90_vm0, %v78_v37 }
  0x27   :  { %1506 = vmatprep.mubr.msk.f32.mxu0 %vm90_vm0, %v59_v38  ;;  %1536 = vmatprep.mubr.msk.f32.mxu1 %vm90_vm0, %v79_v39 }
  0x2a   :  { %1507 = vmatmul.mubr.msk.f32.gmra.mrb[18].mxu0 %vm90_vm0, %v60_v40  ;;  %1537 = vmatmul.mubr.msk.f32.gmra.mrb[18].mxu1 %vm90_vm0, %v80_v41 }
  0xd9   :  { %v1481_v46 = vpop.f32.mrb[0].mxu0  ;;  %v1511_v47 = vpop.f32.mrb[0].mxu1 }
  0xda   :  { %v283_v48 = vadd.f32 %v1481_v46, %v2016_v45  ;;  %v383_v49 = vadd.f32 %v1511_v47, %v2016_v45  ;;  %v277_v50 = vpop.f32.mrb[1].mxu0  ;;  %v377_v51 = vpop.f32.mrb[1].mxu1 }
  0xdb   :  { %v278_v52 = vadd.f32 %v2016_v45, %v277_v50  ;;  %v378_v53 = vadd.f32 %v2016_v45, %v377_v51 }
  0xdc   :  { %478 = vst.msk [vmem:[#allocation2 + $0x8] sm:$0xff] %vm476_vm1, %v283_v48  ;;  %498 = vst.msk [vmem:[#allocation2 + $0xa8] sm:$0xff] %vm476_vm1, %v383_v49 }
  0xdd   :  { %477 = vst.msk [vmem:[#allocation2] sm:$0xff] %vm476_vm1, %v278_v52  ;;  %497 = vst.msk [vmem:[#allocation2 + $0xa0] sm:$0xff] %vm476_vm1, %v378_v53  ;;  %v1484_v54 = vpop.f32.mrb[2].mxu0  ;;  %v1514_v55 = vpop.f32.mrb[2].mxu1 }
  0xde   :  { %v293_v56 = vadd.f32 %v1484_v54, %v2016_v45  ;;  %v393_v57 = vadd.f32 %v1514_v55, %v2016_v45  ;;  %v287_v58 = vpop.f32.mrb[3].mxu0  ;;  %v387_v59 = vpop.f32.mrb[3].mxu1 }
  0xdf   :  { %v288_v60 = vadd.f32 %v2016_v45, %v287_v58  ;;  %v388_v61 = vadd.f32 %v2016_v45, %v387_v59 }
  0xe0   :  { %480 = vst.msk [vmem:[#allocation2 + $0x18] sm:$0xff] %vm476_vm1, %v293_v56  ;;  %500 = vst.msk [vmem:[#allocation2 + $0xb8] sm:$0xff] %vm476_vm1, %v393_v57 }
  0xe1   :  { %479 = vst.msk [vmem:[#allocation2 + $0x10] sm:$0xff] %vm476_vm1, %v288_v60  ;;  %499 = vst.msk [vmem:[#allocation2 + $0xb0] sm:$0xff] %vm476_vm1, %v388_v61  ;;  %v1487_v62 = vpop.f32.mrb[4].mxu0  ;;  %v1517_v63 = vpop.f32.mrb[4].mxu1 }
  0xe2   :  { %v303_v1 = vadd.f32 %v1487_v62, %v2016_v45  ;;  %v403_v2 = vadd.f32 %v1517_v63, %v2016_v45  ;;  %v297_v3 = vpop.f32.mrb[5].mxu0  ;;  %v397_v4 = vpop.f32.mrb[5].mxu1 }
  0xe3   :  { %v298_v5 = vadd.f32 %v2016_v45, %v297_v3  ;;  %v398_v6 = vadd.f32 %v2016_v45, %v397_v4  ;;  %v1732_v4 = vmov %v1833_v0  }
  0xe4   :  { %482 = vst.msk [vmem:[#allocation2 + $0x28] sm:$0xff] %vm476_vm1, %v303_v1  ;;  %502 = vst.msk [vmem:[#allocation2 + $0xc8] sm:$0xff] %vm476_vm1, %v403_v2 }
  0xe5   :  { %481 = vst.msk [vmem:[#allocation2 + $0x20] sm:$0xff] %vm476_vm1, %v298_v5  ;;  %501 = vst.msk [vmem:[#allocation2 + $0xc0] sm:$0xff] %vm476_vm1, %v398_v6  ;;  %v1490_v7 = vpop.f32.mrb[6].mxu0  ;;  %v1520_v8 = vpop.f32.mrb[6].mxu1 }
  0xe6   :  { %v313_v9 = vadd.f32 %v1490_v7, %v2016_v45  ;;  %v413_v10 = vadd.f32 %v1520_v8, %v2016_v45  ;;  %v307_v11 = vpop.f32.mrb[7].mxu0  ;;  %v407_v12 = vpop.f32.mrb[7].mxu1 }
  0xe7   :  { %v308_v13 = vadd.f32 %v2016_v45, %v307_v11  ;;  %v408_v14 = vadd.f32 %v2016_v45, %v407_v12 }
  0xe8   :  { %484 = vst.msk [vmem:[#allocation2 + $0x38] sm:$0xff] %vm476_vm1, %v313_v9  ;;  %504 = vst.msk [vmem:[#allocation2 + $0xd8] sm:$0xff] %vm476_vm1, %v413_v10 }
  0xe9   :  { %483 = vst.msk [vmem:[#allocation2 + $0x30] sm:$0xff] %vm476_vm1, %v308_v13  ;;  %503 = vst.msk [vmem:[#allocation2 + $0xd0] sm:$0xff] %vm476_vm1, %v408_v14  ;;  %v1493_v15 = vpop.f32.mrb[8].mxu0  ;;  %v1523_v16 = vpop.f32.mrb[8].mxu1 }
  0xea   :  { %v323_v17 = vadd.f32 %v1493_v15, %v2016_v45  ;;  %v423_v18 = vadd.f32 %v1523_v16, %v2016_v45  ;;  %v317_v19 = vpop.f32.mrb[9].mxu0  ;;  %v417_v20 = vpop.f32.mrb[9].mxu1 }
  0xeb   :  { %v318_v21 = vadd.f32 %v2016_v45, %v317_v19  ;;  %v418_v22 = vadd.f32 %v2016_v45, %v417_v20 }
  0xec   :  { %486 = vst.msk [vmem:[#allocation2 + $0x48] sm:$0xff] %vm476_vm1, %v323_v17  ;;  %506 = vst.msk [vmem:[#allocation2 + $0xe8] sm:$0xff] %vm476_vm1, %v423_v18 }
  0xed   :  { %485 = vst.msk [vmem:[#allocation2 + $0x40] sm:$0xff] %vm476_vm1, %v318_v21  ;;  %505 = vst.msk [vmem:[#allocation2 + $0xe0] sm:$0xff] %vm476_vm1, %v418_v22  ;;  %v1496_v23 = vpop.f32.mrb[10].mxu0  ;;  %v1526_v24 = vpop.f32.mrb[10].mxu1 }
  0xee   :  { %v333_v25 = vadd.f32 %v1496_v23, %v2016_v45  ;;  %v433_v26 = vadd.f32 %v1526_v24, %v2016_v45  ;;  %v327_v27 = vpop.f32.mrb[11].mxu0  ;;  %v427_v28 = vpop.f32.mrb[11].mxu1 }
  0xef   :  { %v328_v29 = vadd.f32 %v2016_v45, %v327_v27  ;;  %v428_v30 = vadd.f32 %v2016_v45, %v427_v28 }
  0xf0   :  { %488 = vst.msk [vmem:[#allocation2 + $0x58] sm:$0xff] %vm476_vm1, %v333_v25  ;;  %508 = vst.msk [vmem:[#allocation2 + $0xf8] sm:$0xff] %vm476_vm1, %v433_v26 }
  0xf1   :  { %487 = vst.msk [vmem:[#allocation2 + $0x50] sm:$0xff] %vm476_vm1, %v328_v29  ;;  %507 = vst.msk [vmem:[#allocation2 + $0xf0] sm:$0xff] %vm476_vm1, %v428_v30  ;;  %v1499_v31 = vpop.f32.mrb[12].mxu0  ;;  %v1529_v32 = vpop.f32.mrb[12].mxu1 }
  0xf2   :  { %v343_v33 = vadd.f32 %v1499_v31, %v2016_v45  ;;  %v443_v34 = vadd.f32 %v1529_v32, %v2016_v45  ;;  %v337_v35 = vpop.f32.mrb[13].mxu0  ;;  %v437_v36 = vpop.f32.mrb[13].mxu1 }
  0xf3   :  { %v338_v37 = vadd.f32 %v2016_v45, %v337_v35  ;;  %v438_v38 = vadd.f32 %v2016_v45, %v437_v36 }
  0xf4   :  { %490 = vst.msk [vmem:[#allocation2 + $0x68] sm:$0xff] %vm476_vm1, %v343_v33  ;;  %510 = vst.msk [vmem:[#allocation2 + $0x108] sm:$0xff] %vm476_vm1, %v443_v34 }
  0xf5   :  { %489 = vst.msk [vmem:[#allocation2 + $0x60] sm:$0xff] %vm476_vm1, %v338_v37  ;;  %509 = vst.msk [vmem:[#allocation2 + $0x100] sm:$0xff] %vm476_vm1, %v438_v38  ;;  %v1502_v39 = vpop.f32.mrb[14].mxu0  ;;  %v1532_v40 = vpop.f32.mrb[14].mxu1 }
  0xf6   :  { %v353_v41 = vadd.f32 %v1502_v39, %v2016_v45  ;;  %v453_v46 = vadd.f32 %v1532_v40, %v2016_v45  ;;  %v347_v47 = vpop.f32.mrb[15].mxu0  ;;  %v447_v48 = vpop.f32.mrb[15].mxu1 }
  0xf7   :  { %v348_v49 = vadd.f32 %v2016_v45, %v347_v47  ;;  %v448_v50 = vadd.f32 %v2016_v45, %v447_v48 }
  0xf8   :  { %492 = vst.msk [vmem:[#allocation2 + $0x78] sm:$0xff] %vm476_vm1, %v353_v41  ;;  %512 = vst.msk [vmem:[#allocation2 + $0x118] sm:$0xff] %vm476_vm1, %v453_v46 }
  0xf9   :  { %491 = vst.msk [vmem:[#allocation2 + $0x70] sm:$0xff] %vm476_vm1, %v348_v49  ;;  %511 = vst.msk [vmem:[#allocation2 + $0x110] sm:$0xff] %vm476_vm1, %v448_v50  ;;  %v1505_v51 = vpop.f32.mrb[16].mxu0  ;;  %v1535_v52 = vpop.f32.mrb[16].mxu1 }
  0xfa   :  { %v363_v53 = vadd.f32 %v1505_v51, %v2016_v45  ;;  %v463_v54 = vadd.f32 %v1535_v52, %v2016_v45  ;;  %v357_v55 = vpop.f32.mrb[17].mxu0  ;;  %v457_v56 = vpop.f32.mrb[17].mxu1 }
  0xfb   :  { %v358_v57 = vadd.f32 %v2016_v45, %v357_v55  ;;  %v458_v58 = vadd.f32 %v2016_v45, %v457_v56 }
  0xfc   :  { %494 = vst.msk [vmem:[#allocation2 + $0x88] sm:$0xff] %vm476_vm1, %v363_v53  ;;  %514 = vst.msk [vmem:[#allocation2 + $0x128] sm:$0xff] %vm476_vm1, %v463_v54 }
  0xfd   :  { %493 = vst.msk [vmem:[#allocation2 + $0x80] sm:$0xff] %vm476_vm1, %v358_v57  ;;  %513 = vst.msk [vmem:[#allocation2 + $0x120] sm:$0xff] %vm476_vm1, %v458_v58  ;;  %v1508_v59 = vpop.f32.mrb[18].mxu0  ;;  %v1538_v60 = vpop.f32.mrb[18].mxu1 }
  0xfe   :  { %v373_v61 = vadd.f32 %v1508_v59, %v2016_v45  ;;  %v473_v62 = vadd.f32 %v1538_v60, %v2016_v45  ;;  %v367_v63 = vpop.f32.mrb[19].mxu0  ;;  %v467_v1 = vpop.f32.mrb[19].mxu1 }
  0xff   :  { %v368_v2 = vadd.f32 %v2016_v45, %v367_v63  ;;  %v468_v3 = vadd.f32 %v2016_v45, %v467_v1 }
 0x100   :  { %496 = vst.msk [vmem:[#allocation2 + $0x98] sm:$0xff] %vm476_vm1, %v373_v61  ;;  %516 = vst.msk [vmem:[#allocation2 + $0x138] sm:$0xff] %vm476_vm1, %v473_v62 }
 0x101   :  { %495 = vst.msk [vmem:[#allocation2 + $0x90] sm:$0xff] %vm476_vm1, %v368_v2  ;;  %515 = vst.msk [vmem:[#allocation2 + $0x130] sm:$0xff] %vm476_vm1, %v468_v3 }
 0x102 LB: > { %v1618_v45 = vpack.c.bf16 %v2006_v43, %v2001_v42  ;;  %v1748_v5 = vmov 0.0|0.0   ;;  %vm1749_vm2 = vmmov 0   ;;  %v1750_v6 = vmov 0.0   ;;  %s1751_s5 = smov 96   ;;  %s1339_s6 = sshll.u32 %s1738_s4, 1  ;;  %s1738_s4 = sphi %s2099_s4, %s525_s4   ;;  %v1734_v4 = vphi %v1732_v4, %v1733_v4  }
 0x103   : > { %1617 = vmatprep.subr.bf16.mxu0 %v1748_v5  ;;  %1543 = vmatprep.mubr.msk.f32.mxu0 %vm1749_vm2, %v1750_v6  ;;  %vm536_vm3 = vcmask 130048   ;;  %s528_s13 = scalar_lea.vmem [#allocation2], %s1339_s6  ;;  %s1752_s3 = smov 32   ;;  %vm644_vm4 = vcmask 123904  }
 0x104   : > { %1619 = vmatpush3.bf16.msra.mxu0 %v1618_v45  ;;  %s1753_s14 = smov 112   ;;  %s1754_s15 = smov 16  }
 0x105   : > { %s643_s16 = scalar_lea.vmem [#allocation3], %s1339_s6  ;;  %s525_s4 = sadd.s32 1, %s1738_s4  }
 0x106   : > { %p522_p0 = scmp.ge.s32.totalorder %s525_s4, 160  }
 0x107   : > { %1544 = vmatmul.mubr.msk.f32.vlgmr.msra.gmra.mrb[0].mxu0 %vm536_vm3, %v1734_v4  ;;  %v2124_v27 = vld [vmem:[%s2311_s2] sm:$0x3] (%p522_p0)   ;;  %v688_v29 = vld [vmem:[%s2316_s7 + $0x8] sm:$0xff] (%p522_p0) }
 0x108   : > { %v529_v9 = vld [vmem:[%s528_s13] sm:$0x3] }
 0x109   :  { %v687_v28 = vld [vmem:[%s2316_s7] sm:$0xff] (%p522_p0) }
 0x10a   :  { %v1620_v30 = vpack.c.bf16 (%p522_p0), %v688_v29, %v687_v28 }
 0x10c   :  { %1621 = vmatprep.subr.bf16.mxu0 (%p522_p0), %v1620_v30  ;;  %1629 = vmatprep.subr.bf16.mxu1 (%p522_p0), %v1620_v30 }
 0x10d   :  { %1623 = vmatpush3.bf16.msra.mxu0 (%p522_p0), %v1620_v30  ;;  %1630 = vmatpush3.bf16.msra.mxu1 (%p522_p0), %v1620_v30 }
 0x1da   : > { %v606_v0 = vpop.f32.mrb[0].mxu0 }
 0x1db   : > { %v607_v7 = vadd.f32 %v2011_v44, %v606_v0  ;;  %v1545_v8 = vpop.f32.mrb[1].mxu0 }
 0x1dc   :  { %v2180_v8 = vld [vmem:[%s2317_s8 + $0x8] sm:$0xff] (%p522_p0) }
 0x1dd   : > { %618 = vrot.lane.b32.xlu0 %v607_v7, %s1751_s5  ;;  %v610_v10 = vadd.f32 %v607_v7, %v529_v9  ;;  %v2175_v7 = vld [vmem:[%s2317_s8] sm:$0xff] (%p522_p0)  ;;  %s2273_s8 = smov (%p522_p0), 0  }
 0x1df   : > { %v1342_v11 = vmul.f32 -1.442695, %v610_v10  ;;  %v2190_v10 = vld [vmem:[%s2318_s9] ss:$0 sm:$0xff] (%p522_p0) }
 0x1e1   : > { %1680 = vpow2.f32 %v1342_v11 }
 0x1eb   : > { %v1681_v12 = vpop.eup %1680 }
 0x1ec   : > { %v614_v13 = vadd.f32 1.0, %v1681_v12 }
 0x1ee   : > { %1682 = vrcp.f32 %v614_v13 }
 0x1f8   : > { %v1683_v14 = vpop.eup %1682 }
 0x1f9   : > { %v628_v21 = vsub.f32 1.0, %v1683_v14 }
 0x24f   : > { %v619_v15 = vpop.permute.xlu0 %618 }
 0x250   : > { %v621_v16 = vmul.f32 %v1683_v14, %v619_v15 }
 0x252   : > { %623 = vrot.lane.b32.xlu0 %v621_v16, %s1752_s3 }
 0x2c4   : > { %v624_v17 = vpop.permute.xlu0 %623 }
 0x2c5   : > { %v626_v18 = vadd.f32 %v624_v17, %v529_v9  ;;  %v2185_v9 = vld [vmem:[%s2319_s10] ss:$0 sm:$0xff] (%p522_p0) }
 0x2c7   : > { %1684 = vtanh.f32 %v626_v18 }
 0x2d1   : > { %v1685_v19 = vpop.eup %1684 }
 0x2d2   : > { %630 = vrot.lane.b32.xlu1 %v1685_v19, %s1753_s14 }
 0x2d6   : > { %634 = vrot.lane.b32.xlu1 %v1734_v4, %s1754_s15 }
 0x344   : > { %v631_v20 = vpop.permute.xlu1 %630 }
 0x345   : > { %v633_v23 = vmul.f32 %v631_v20, %v628_v21 }
 0x348   : > { %v635_v22 = vpop.permute.xlu1 %634 }
 0x349   : > { %v637_v24 = vmul.f32 %v1683_v14, %v635_v22 }
 0x34b   : > { %v638_v25 = vadd.f32 %v637_v24, %v633_v23 }
 0x34d   : > { %640 = vrot.lane.b32.xlu0 %v638_v25, %s1753_s14 }
 0x3bb   :  { %524 = sbr.rel (!%p522_p0) target bundleno = 258 (0x102), region = 91 }
 0x3bf   : > { %v2111_v4 = vpop.permute.xlu0 %640  }
 0x3c0   : > { %v2322_v26 = vmov %v2111_v4 }
 0x3c1   : > { %645 = vst.msk [vmem:[%s643_s16] sm:$0x3] %vm644_vm4, %v2322_v26  ;;  %v1733_v4 = vmov %v2322_v26  }
 0x3c8   :  { %v646_v31 = vld [vmem:[#allocation3] sm:$0xff]  ;;  %v647_v42 = vld [vmem:[#allocation3 + $0x8] sm:$0xff]  ;;  %v648_v44 = vld [vmem:[#allocation3 + $0x10] sm:$0xff] }
 0x3c9   :  { %v666_v32 = vld [vmem:[#allocation3 + $0xa0] sm:$0xff]  ;;  %1550 = vmatprep.mubr.msk.f32.mxu0 %vm536_vm3, %v646_v31  ;;  %v667_v43 = vld [vmem:[#allocation3 + $0xa8] sm:$0xff]  ;;  %v668_v33 = vld [vmem:[#allocation3 + $0xb0] sm:$0xff] }
 0x3ca   :  { %1580 = vmatprep.mubr.msk.f32.mxu1 %vm536_vm3, %v666_v32  ;;  %1551 = vmatmul.mubr.msk.f32.vlgmr.msra.gmra.mrb[0].mxu0 %vm536_vm3, %v647_v42  ;;  %v649_v34 = vld [vmem:[#allocation3 + $0x18] sm:$0xff]  ;;  %v650_v36 = vld [vmem:[#allocation3 + $0x20] sm:$0xff]  ;;  %v651_v38 = vld [vmem:[#allocation3 + $0x28] sm:$0xff] }
 0x3cb   :  { %1581 = vmatmul.mubr.msk.f32.vlgmr.msra.gmra.mrb[0].mxu1 %vm536_vm3, %v667_v43  ;;  %1553 = vmatprep.mubr.msk.f32.mxu0 %vm536_vm3, %v648_v44  ;;  %v669_v35 = vld [vmem:[#allocation3 + $0xb8] sm:$0xff]  ;;  %v670_v37 = vld [vmem:[#allocation3 + $0xc0] sm:$0xff]  ;;  %v671_v39 = vld [vmem:[#allocation3 + $0xc8] sm:$0xff] }
 0x3cc   :  { %1583 = vmatprep.mubr.msk.f32.mxu1 %vm536_vm3, %v668_v33  ;;  %v652_v40 = vld [vmem:[#allocation3 + $0x30] sm:$0xff]  ;;  %v653_v46 = vld [vmem:[#allocation3 + $0x38] sm:$0xff]  ;;  %v654_v48 = vld [vmem:[#allocation3 + $0x40] sm:$0xff] }
 0x3cd   :  { %v672_v41 = vld [vmem:[#allocation3 + $0xd0] sm:$0xff]  ;;  %v673_v47 = vld [vmem:[#allocation3 + $0xd8] sm:$0xff]  ;;  %v674_v49 = vld [vmem:[#allocation3 + $0xe0] sm:$0xff] }
 0x3ce   :  { %1554 = vmatmul.mubr.msk.f32.gmra.mrb[2].mxu0 %vm536_vm3, %v649_v34  ;;  %v655_v50 = vld [vmem:[#allocation3 + $0x48] sm:$0xff]  ;;  %v656_v52 = vld [vmem:[#allocation3 + $0x50] sm:$0xff]  ;;  %v657_v54 = vld [vmem:[#allocation3 + $0x58] sm:$0xff] }
 0x3cf   :  { %1584 = vmatmul.mubr.msk.f32.gmra.mrb[2].mxu1 %vm536_vm3, %v669_v35  ;;  %1556 = vmatprep.mubr.msk.f32.mxu0 %vm536_vm3, %v650_v36  ;;  %v675_v51 = vld [vmem:[#allocation3 + $0xe8] sm:$0xff]  ;;  %v676_v53 = vld [vmem:[#allocation3 + $0xf0] sm:$0xff]  ;;  %v677_v55 = vld [vmem:[#allocation3 + $0xf8] sm:$0xff] }
 0x3d0   :  { %1586 = vmatprep.mubr.msk.f32.mxu1 %vm536_vm3, %v670_v37  ;;  %v658_v56 = vld [vmem:[#allocation3 + $0x60] sm:$0xff]  ;;  %v659_v58 = vld [vmem:[#allocation3 + $0x68] sm:$0xff]  ;;  %v660_v60 = vld [vmem:[#allocation3 + $0x70] sm:$0xff] }
 0x3d1   :  { %v678_v57 = vld [vmem:[#allocation3 + $0x100] sm:$0xff]  ;;  %v679_v59 = vld [vmem:[#allocation3 + $0x108] sm:$0xff]  ;;  %v680_v61 = vld [vmem:[#allocation3 + $0x110] sm:$0xff] }
 0x3d2   :  { %1557 = vmatmul.mubr.msk.f32.gmra.mrb[4].mxu0 %vm536_vm3, %v651_v38  ;;  %v661_v62 = vld [vmem:[#allocation3 + $0x78] sm:$0xff]  ;;  %v662_v1 = vld [vmem:[#allocation3 + $0x80] sm:$0xff]  ;;  %v663_v3 = vld [vmem:[#allocation3 + $0x88] sm:$0xff] }
 0x3d3   :  { %1587 = vmatmul.mubr.msk.f32.gmra.mrb[4].mxu1 %vm536_vm3, %v671_v39  ;;  %1559 = vmatprep.mubr.msk.f32.mxu0 %vm536_vm3, %v652_v40  ;;  %v681_v63 = vld [vmem:[#allocation3 + $0x118] sm:$0xff]  ;;  %v682_v2 = vld [vmem:[#allocation3 + $0x120] sm:$0xff]  ;;  %v683_v4 = vld [vmem:[#allocation3 + $0x128] sm:$0xff] }
 0x3d4   :  { %1589 = vmatprep.mubr.msk.f32.mxu1 %vm536_vm3, %v672_v41  ;;  %v664_v45 = vld [vmem:[#allocation3 + $0x90] sm:$0xff]  ;;  %v665_v6 = vld [vmem:[#allocation3 + $0x98] sm:$0xff] }
 0x3d5   :  { %v684_v5 = vld [vmem:[#allocation3 + $0x130] sm:$0xff]  ;;  %v685_v0 = vld [vmem:[#allocation3 + $0x138] sm:$0xff] }
 0x3d6   :  { %1560 = vmatmul.mubr.msk.f32.gmra.mrb[6].mxu0 %vm536_vm3, %v653_v46 }
 0x3d7   :  { %1590 = vmatmul.mubr.msk.f32.gmra.mrb[6].mxu1 %vm536_vm3, %v673_v47  ;;  %1562 = vmatprep.mubr.msk.f32.mxu0 %vm536_vm3, %v654_v48 }
 0x3d8   :  { %1592 = vmatprep.mubr.msk.f32.mxu1 %vm536_vm3, %v674_v49 }
 0x3da   :  { %1563 = vmatmul.mubr.msk.f32.gmra.mrb[8].mxu0 %vm536_vm3, %v655_v50 }
 0x3db   :  { %1593 = vmatmul.mubr.msk.f32.gmra.mrb[8].mxu1 %vm536_vm3, %v675_v51  ;;  %1565 = vmatprep.mubr.msk.f32.mxu0 %vm536_vm3, %v656_v52 }
 0x3dc   :  { %1595 = vmatprep.mubr.msk.f32.mxu1 %vm536_vm3, %v676_v53 }
 0x3de   :  { %1566 = vmatmul.mubr.msk.f32.gmra.mrb[10].mxu0 %vm536_vm3, %v657_v54 }
 0x3df   :  { %1596 = vmatmul.mubr.msk.f32.gmra.mrb[10].mxu1 %vm536_vm3, %v677_v55  ;;  %1568 = vmatprep.mubr.msk.f32.mxu0 %vm536_vm3, %v658_v56 }
 0x3e0   :  { %1598 = vmatprep.mubr.msk.f32.mxu1 %vm536_vm3, %v678_v57 }
 0x3e2   :  { %1569 = vmatmul.mubr.msk.f32.gmra.mrb[12].mxu0 %vm536_vm3, %v659_v58 }
 0x3e3   :  { %1599 = vmatmul.mubr.msk.f32.gmra.mrb[12].mxu1 %vm536_vm3, %v679_v59  ;;  %1571 = vmatprep.mubr.msk.f32.mxu0 %vm536_vm3, %v660_v60 }
 0x3e4   :  { %1601 = vmatprep.mubr.msk.f32.mxu1 %vm536_vm3, %v680_v61 }
 0x3e6   :  { %1572 = vmatmul.mubr.msk.f32.gmra.mrb[14].mxu0 %vm536_vm3, %v661_v62 }
 0x3e7   :  { %1602 = vmatmul.mubr.msk.f32.gmra.mrb[14].mxu1 %vm536_vm3, %v681_v63  ;;  %1574 = vmatprep.mubr.msk.f32.mxu0 %vm536_vm3, %v662_v1 }
 0x3e8   :  { %1604 = vmatprep.mubr.msk.f32.mxu1 %vm536_vm3, %v682_v2 }
 0x3ea   :  { %1575 = vmatmul.mubr.msk.f32.gmra.mrb[16].mxu0 %vm536_vm3, %v663_v3 }
 0x3eb   :  { %1605 = vmatmul.mubr.msk.f32.gmra.mrb[16].mxu1 %vm536_vm3, %v683_v4  ;;  %1577 = vmatprep.mubr.msk.f32.mxu0 %vm536_vm3, %v664_v45 }
 0x3ec   :  { %1607 = vmatprep.mubr.msk.f32.mxu1 %vm536_vm3, %v684_v5 }
 0x3ee   :  { %1578 = vmatmul.mubr.msk.f32.gmra.mrb[18].mxu0 %vm536_vm3, %v665_v6 }
 0x3ef   :  { %1608 = vmatmul.mubr.msk.f32.gmra.mrb[18].mxu1 %vm536_vm3, %v685_v0 }
 0x49d   :  { %v1552_v11 = vpop.f32.mrb[0].mxu0 }
 0x49e   :  { %v1582_v12 = vpop.f32.mrb[0].mxu1  ;;  %v889_v13 = vadd.f32 %v1552_v11, %v2190_v10  ;;  %v883_v15 = vpop.f32.mrb[1].mxu0 }
 0x49f   :  { %v989_v14 = vadd.f32 %v1582_v12, %v2190_v10  ;;  %v983_v16 = vpop.f32.mrb[1].mxu1  ;;  %v884_v17 = vadd.f32 %v2190_v10, %v883_v15 }
 0x4a0   :  { %v984_v18 = vadd.f32 %v2190_v10, %v983_v16  ;;  %1083 = vst.msk [vmem:[#allocation2 + $0x8] sm:$0xff] %vm476_vm1, %v889_v13 }
 0x4a1   :  { %1103 = vst.msk [vmem:[#allocation2 + $0xa8] sm:$0xff] %vm476_vm1, %v989_v14  ;;  %1082 = vst.msk [vmem:[#allocation2] sm:$0xff] %vm476_vm1, %v884_v17  ;;  %v1555_v19 = vpop.f32.mrb[2].mxu0 }
 0x4a2   :  { %1102 = vst.msk [vmem:[#allocation2 + $0xa0] sm:$0xff] %vm476_vm1, %v984_v18  ;;  %v1585_v20 = vpop.f32.mrb[2].mxu1  ;;  %v899_v21 = vadd.f32 %v1555_v19, %v2190_v10  ;;  %v893_v23 = vpop.f32.mrb[3].mxu0 }
 0x4a3   :  { %v999_v22 = vadd.f32 %v1585_v20, %v2190_v10  ;;  %v993_v24 = vpop.f32.mrb[3].mxu1  ;;  %v894_v25 = vadd.f32 %v2190_v10, %v893_v23 }
 0x4a4   :  { %v994_v28 = vadd.f32 %v2190_v10, %v993_v24  ;;  %1085 = vst.msk [vmem:[#allocation2 + $0x18] sm:$0xff] %vm476_vm1, %v899_v21 }
 0x4a5   :  { %1105 = vst.msk [vmem:[#allocation2 + $0xb8] sm:$0xff] %vm476_vm1, %v999_v22  ;;  %1084 = vst.msk [vmem:[#allocation2 + $0x10] sm:$0xff] %vm476_vm1, %v894_v25  ;;  %v1558_v29 = vpop.f32.mrb[4].mxu0 }
 0x4a6   :  { %1104 = vst.msk [vmem:[#allocation2 + $0xb0] sm:$0xff] %vm476_vm1, %v994_v28  ;;  %v1588_v30 = vpop.f32.mrb[4].mxu1  ;;  %v909_v31 = vadd.f32 %v1558_v29, %v2190_v10  ;;  %v903_v42 = vpop.f32.mrb[5].mxu0 }
 0x4a7   :  { %v1009_v32 = vadd.f32 %v1588_v30, %v2190_v10  ;;  %v1003_v43 = vpop.f32.mrb[5].mxu1  ;;  %v904_v44 = vadd.f32 %v2190_v10, %v903_v42 }
 0x4a8   :  { %v1004_v33 = vadd.f32 %v2190_v10, %v1003_v43  ;;  %1087 = vst.msk [vmem:[#allocation2 + $0x28] sm:$0xff] %vm476_vm1, %v909_v31 }
 0x4a9   :  { %1107 = vst.msk [vmem:[#allocation2 + $0xc8] sm:$0xff] %vm476_vm1, %v1009_v32  ;;  %1086 = vst.msk [vmem:[#allocation2 + $0x20] sm:$0xff] %vm476_vm1, %v904_v44  ;;  %v1561_v34 = vpop.f32.mrb[6].mxu0  ;;  %v1740_v44 = vmov %v2124_v27  }
 0x4aa   :  { %1106 = vst.msk [vmem:[#allocation2 + $0xc0] sm:$0xff] %vm476_vm1, %v1004_v33  ;;  %v1591_v35 = vpop.f32.mrb[6].mxu1  ;;  %v919_v36 = vadd.f32 %v1561_v34, %v2190_v10  ;;  %v913_v38 = vpop.f32.mrb[7].mxu0 }
 0x4ab   :  { %v1019_v37 = vadd.f32 %v1591_v35, %v2190_v10  ;;  %v1013_v39 = vpop.f32.mrb[7].mxu1  ;;  %v914_v40 = vadd.f32 %v2190_v10, %v913_v38 }
 0x4ac   :  { %v1014_v41 = vadd.f32 %v2190_v10, %v1013_v39  ;;  %1089 = vst.msk [vmem:[#allocation2 + $0x38] sm:$0xff] %vm476_vm1, %v919_v36 }
 0x4ad   :  { %1109 = vst.msk [vmem:[#allocation2 + $0xd8] sm:$0xff] %vm476_vm1, %v1019_v37  ;;  %1088 = vst.msk [vmem:[#allocation2 + $0x30] sm:$0xff] %vm476_vm1, %v914_v40  ;;  %v1564_v46 = vpop.f32.mrb[8].mxu0 }
 0x4ae   :  { %1108 = vst.msk [vmem:[#allocation2 + $0xd0] sm:$0xff] %vm476_vm1, %v1014_v41  ;;  %v1594_v47 = vpop.f32.mrb[8].mxu1  ;;  %v929_v48 = vadd.f32 %v1564_v46, %v2190_v10  ;;  %v923_v50 = vpop.f32.mrb[9].mxu0 }
 0x4af   :  { %v1029_v49 = vadd.f32 %v1594_v47, %v2190_v10  ;;  %v1023_v51 = vpop.f32.mrb[9].mxu1  ;;  %v924_v52 = vadd.f32 %v2190_v10, %v923_v50 }
 0x4b0   :  { %v1024_v53 = vadd.f32 %v2190_v10, %v1023_v51  ;;  %1091 = vst.msk [vmem:[#allocation2 + $0x48] sm:$0xff] %vm476_vm1, %v929_v48 }
 0x4b1   :  { %1111 = vst.msk [vmem:[#allocation2 + $0xe8] sm:$0xff] %vm476_vm1, %v1029_v49  ;;  %1090 = vst.msk [vmem:[#allocation2 + $0x40] sm:$0xff] %vm476_vm1, %v924_v52  ;;  %v1567_v54 = vpop.f32.mrb[10].mxu0 }
 0x4b2   :  { %1110 = vst.msk [vmem:[#allocation2 + $0xe0] sm:$0xff] %vm476_vm1, %v1024_v53  ;;  %v1597_v55 = vpop.f32.mrb[10].mxu1  ;;  %v939_v56 = vadd.f32 %v1567_v54, %v2190_v10  ;;  %v933_v58 = vpop.f32.mrb[11].mxu0 }
 0x4b3   :  { %v1039_v57 = vadd.f32 %v1597_v55, %v2190_v10  ;;  %v1033_v59 = vpop.f32.mrb[11].mxu1  ;;  %v934_v60 = vadd.f32 %v2190_v10, %v933_v58 }
 0x4b4   :  { %v1034_v61 = vadd.f32 %v2190_v10, %v1033_v59  ;;  %1093 = vst.msk [vmem:[#allocation2 + $0x58] sm:$0xff] %vm476_vm1, %v939_v56 }
 0x4b5   :  { %1113 = vst.msk [vmem:[#allocation2 + $0xf8] sm:$0xff] %vm476_vm1, %v1039_v57  ;;  %1092 = vst.msk [vmem:[#allocation2 + $0x50] sm:$0xff] %vm476_vm1, %v934_v60  ;;  %v1570_v62 = vpop.f32.mrb[12].mxu0 }
 0x4b6   :  { %1112 = vst.msk [vmem:[#allocation2 + $0xf0] sm:$0xff] %vm476_vm1, %v1034_v61  ;;  %v1600_v63 = vpop.f32.mrb[12].mxu1  ;;  %v949_v1 = vadd.f32 %v1570_v62, %v2190_v10  ;;  %v943_v3 = vpop.f32.mrb[13].mxu0 }
 0x4b7   :  { %v1049_v2 = vadd.f32 %v1600_v63, %v2190_v10  ;;  %v1043_v4 = vpop.f32.mrb[13].mxu1  ;;  %v944_v45 = vadd.f32 %v2190_v10, %v943_v3 }
 0x4b8   :  { %v1044_v5 = vadd.f32 %v2190_v10, %v1043_v4  ;;  %1095 = vst.msk [vmem:[#allocation2 + $0x68] sm:$0xff] %vm476_vm1, %v949_v1 }
 0x4b9   :  { %1115 = vst.msk [vmem:[#allocation2 + $0x108] sm:$0xff] %vm476_vm1, %v1049_v2  ;;  %1094 = vst.msk [vmem:[#allocation2 + $0x60] sm:$0xff] %vm476_vm1, %v944_v45  ;;  %v1573_v6 = vpop.f32.mrb[14].mxu0 }
 0x4ba   :  { %1114 = vst.msk [vmem:[#allocation2 + $0x100] sm:$0xff] %vm476_vm1, %v1044_v5  ;;  %v1603_v0 = vpop.f32.mrb[14].mxu1  ;;  %v959_v11 = vadd.f32 %v1573_v6, %v2190_v10  ;;  %v953_v13 = vpop.f32.mrb[15].mxu0 }
 0x4bb   :  { %v1059_v12 = vadd.f32 %v1603_v0, %v2190_v10  ;;  %v1053_v14 = vpop.f32.mrb[15].mxu1  ;;  %v954_v15 = vadd.f32 %v2190_v10, %v953_v13 }
 0x4bc   :  { %v1054_v16 = vadd.f32 %v2190_v10, %v1053_v14  ;;  %1097 = vst.msk [vmem:[#allocation2 + $0x78] sm:$0xff] %vm476_vm1, %v959_v11 }
 0x4bd   :  { %1117 = vst.msk [vmem:[#allocation2 + $0x118] sm:$0xff] %vm476_vm1, %v1059_v12  ;;  %1096 = vst.msk [vmem:[#allocation2 + $0x70] sm:$0xff] %vm476_vm1, %v954_v15  ;;  %v1576_v17 = vpop.f32.mrb[16].mxu0 }
 0x4be   :  { %1116 = vst.msk [vmem:[#allocation2 + $0x110] sm:$0xff] %vm476_vm1, %v1054_v16  ;;  %v1606_v18 = vpop.f32.mrb[16].mxu1  ;;  %v969_v19 = vadd.f32 %v1576_v17, %v2190_v10  ;;  %v963_v21 = vpop.f32.mrb[17].mxu0 }
 0x4bf   :  { %v1069_v20 = vadd.f32 %v1606_v18, %v2190_v10  ;;  %v1063_v22 = vpop.f32.mrb[17].mxu1  ;;  %v964_v23 = vadd.f32 %v2190_v10, %v963_v21 }
 0x4c0   :  { %v1064_v24 = vadd.f32 %v2190_v10, %v1063_v22  ;;  %1099 = vst.msk [vmem:[#allocation2 + $0x88] sm:$0xff] %vm476_vm1, %v969_v19 }
 0x4c1   :  { %1119 = vst.msk [vmem:[#allocation2 + $0x128] sm:$0xff] %vm476_vm1, %v1069_v20  ;;  %1098 = vst.msk [vmem:[#allocation2 + $0x80] sm:$0xff] %vm476_vm1, %v964_v23  ;;  %v1579_v25 = vpop.f32.mrb[18].mxu0 }
 0x4c2   :  { %1118 = vst.msk [vmem:[#allocation2 + $0x120] sm:$0xff] %vm476_vm1, %v1064_v24  ;;  %v1609_v28 = vpop.f32.mrb[18].mxu1  ;;  %v979_v29 = vadd.f32 %v1579_v25, %v2190_v10  ;;  %v973_v31 = vpop.f32.mrb[19].mxu0 }
 0x4c3   :  { %v1079_v30 = vadd.f32 %v1609_v28, %v2190_v10  ;;  %v1073_v32 = vpop.f32.mrb[19].mxu1  ;;  %v974_v42 = vadd.f32 %v2190_v10, %v973_v31 }
 0x4c4   :  { %v1074_v43 = vadd.f32 %v2190_v10, %v1073_v32  ;;  %1101 = vst.msk [vmem:[#allocation2 + $0x98] sm:$0xff] %vm476_vm1, %v979_v29 }
 0x4c5   :  { %1121 = vst.msk [vmem:[#allocation2 + $0x138] sm:$0xff] %vm476_vm1, %v1079_v30  ;;  %1100 = vst.msk [vmem:[#allocation2 + $0x90] sm:$0xff] %vm476_vm1, %v974_v42 }
 0x4c6   :  { %1120 = vst.msk [vmem:[#allocation2 + $0x130] sm:$0xff] %vm476_vm1, %v1074_v43 }
 0x4c7 LB: > { %v1625_v10 = vpack.c.bf16 %v2180_v8, %v2175_v7  ;;  %v1755_v33 = vmov 0.0|0.0   ;;  %vm1756_vm5 = vmmov 0   ;;  %v1757_v34 = vmov 0.0   ;;  %s1758_s9 = smov 96   ;;  %s1384_s10 = sshll.u32 %s1746_s8, 1  ;;  %s1746_s8 = sphi %s2273_s8, %s1130_s8   ;;  %v1742_v44 = vphi %v1740_v44, %v1741_v44  }
 0x4c8   : > { %1624 = vmatprep.subr.bf16.mxu0 %v1755_v33  ;;  %1614 = vmatprep.mubr.msk.f32.mxu0 %vm1756_vm5, %v1757_v34  ;;  %s1133_s29 = scalar_lea.vmem [#allocation2], %s1384_s10  ;;  %s1759_s30 = smov 32  }
 0x4c9   : > { %1626 = vmatpush3.bf16.msra.mxu0 %v1625_v10  ;;  %s1760_s0 = smov 112   ;;  %s1761_s1 = smov 16  }
 0x4ca   : > { %s1247_s6 = scalar_lea.vmem %s2320_s11, %s1384_s10  ;;  %s1130_s8 = sadd.s32 1, %s1746_s8  }
 0x4cb   : > { %p1127_p1 = scmp.ge.s32.totalorder %s1130_s8, 160  }
 0x4cc   : > { %1615 = vmatmul.mubr.msk.f32.vlgmr.msra.gmra.mrb[0].mxu0 %vm536_vm3, %v1742_v44  ;;  %1251 = vst.msk [vmem:[#allocation4] sm:$0x3] (%p1127_p1), %vm644_vm4, %v2322_v26  ;;  %s1762_s13 = smov (%p1127_p1), [#allocation4]  }
 0x4cd   : > { %v1134_v37 = vld [vmem:[%s1133_s29] sm:$0x3]  ;;  %s1261_s3 = sshll.u32 (%p1127_p1), %s1762_s13, 4  ;;  %s1262_s3 = int_to_ptr.vmem [resolvable:$true] %s1261_s3 }
 0x4ce   :  { %s1692_s14 = scalar_lea.vmem (%p1127_p1), %s1262_s3, 64  ;;  %p1697_p3 = scmp.lt.s32.totalorder (%p1127_p1), %s1262_s3, %s1262_s3 }
 0x4cf   :  { %p1693_p2 = scmp.ne.s32.totalorder (%p1127_p1), %s1262_s3, %s1692_s14  ;;  %p1698_p4 = scmp.lt.s32.totalorder (%p1127_p1), %s1692_s14, %s1692_s14 }
 0x4d1   :  { %p1699_p5 = por (%p1127_p1), %p1698_p4, %p1697_p3 }
 0x4d3   :  { %p1700_p6 = pnand (%p1127_p1), %p1699_p5, %p1693_p2 }
 0x59f   : > { %v1210_v27 = vpop.f32.mrb[0].mxu0 }
 0x5a0   : > { %v1211_v35 = vadd.f32 %v2185_v9, %v1210_v27  ;;  %v1616_v36 = vpop.f32.mrb[1].mxu0 }
 0x5a2   : > { %1222 = vrot.lane.b32.xlu0 %v1211_v35, %s1758_s9  ;;  %v1214_v38 = vadd.f32 %v1211_v35, %v1134_v37 }
 0x5a4   : > { %v1387_v39 = vmul.f32 -1.442695, %v1214_v38 }
 0x5a6   : > { %1686 = vpow2.f32 %v1387_v39 }
 0x5b0   : > { %v1687_v40 = vpop.eup %1686 }
 0x5b1   : > { %v1218_v41 = vadd.f32 1.0, %v1687_v40 }
 0x5b3   : > { %1688 = vrcp.f32 %v1218_v41 }
 0x5bd   : > { %v1689_v46 = vpop.eup %1688 }
 0x5be   : > { %v1232_v53 = vsub.f32 1.0, %v1689_v46 }
 0x614   : > { %v1223_v47 = vpop.permute.xlu0 %1222 }
 0x615   : > { %v1225_v48 = vmul.f32 %v1689_v46, %v1223_v47 }
 0x617   : > { %1227 = vrot.lane.b32.xlu0 %v1225_v48, %s1759_s30 }
 0x689   : > { %v1228_v49 = vpop.permute.xlu0 %1227 }
 0x68a   : > { %v1230_v50 = vadd.f32 %v1228_v49, %v1134_v37 }
 0x68c   : > { %1690 = vtanh.f32 %v1230_v50 }
 0x696   : > { %v1691_v51 = vpop.eup %1690 }
 0x697   : > { %1234 = vrot.lane.b32.xlu1 %v1691_v51, %s1760_s0 }
 0x69b   : > { %1238 = vrot.lane.b32.xlu1 %v1742_v44, %s1761_s1 }
 0x709   : > { %v1235_v52 = vpop.permute.xlu1 %1234 }
 0x70a   : > { %v1237_v55 = vmul.f32 %v1235_v52, %v1232_v53 }
 0x70d   : > { %v1239_v54 = vpop.permute.xlu1 %1238 }
 0x70e   : > { %v1241_v56 = vmul.f32 %v1689_v46, %v1239_v54 }
 0x710   : > { %v1242_v57 = vadd.f32 %v1241_v56, %v1237_v55 }
 0x712   : > { %1244 = vrot.lane.b32.xlu0 %v1242_v57, %s1760_s0 }
 0x77f   :  { %1129 = sbr.rel (!%p1127_p1) target bundleno = 1223 (0x4c7), region = 102 }
 0x784   : > { %v1245_v58 = vpop.permute.xlu0 %1244  }
 0x785   : > { %1249 = vst.msk [vmem:[%s1247_s6] sm:$0x3] %vm644_vm4, %v1245_v58  ;;  %v1741_v44 = vmov %v1245_v58   ;;  %1253 = vst.msk [vmem:[#allocation4 + $0x2] sm:$0x3] (%p1127_p1), %vm644_vm4, %v1245_v58 }
 0x786   :  { %1703 = shalt.err (!%p1700_p6)
}
 0x787   :  { %s1704_s17 = scalar_lea.hbm %s2321_s12, 64 }
 0x788   :  { %p1705_p7 = scmp.ne.s32.totalorder %s2321_s12, %s1704_s17  ;;  %p1708_p8 = scmp.lt.u32.totalorder %s1704_s17, %s2321_s12 }
 0x78a   :  { %p1710_p9 = pnand %p1708_p8, %p1705_p7 }
 0x78c   :  { %1713 = shalt.err (!%p1710_p9)
}
 0x78d   :  { %s1763_s21 = smov 32   ;;  %s1764_s22 = smov 2  }
 0x78e   :  { %1267 = dma.vmem_to_hbm [thread:$0]  %s1262_s3, 64, %s2321_s12, [#allocation5], %s1763_s21, %s1763_s21, %s1764_s22  }
 0x78f   :  { %1730 = dma.done.wait [#allocation5], 64  }
 0x790   :  { %1731 = vsyncadd [#allocation5], 4294967232 }
 0x791   :  { %1273 = vsyncpa [#allocation5], 1 }

</bundles_post_ra>
